<compile_context>
chip_gen: v5e
topology: v5e:2x2
jax: 0.10.0
libtpu: 0.0.40
codegen_flags: <defaults>
</compile_context>

<pallas_src>
import jax
import jax.numpy as jnp
from jax.experimental import pallas as pl
from jax.experimental.pallas import tpu as pltpu


def _round_up(x, m):
    return (x + m - 1) // m * m


# Conservative VMEM budget for tile sizing: fits v7x's 32 MiB scoped default
# (64 MiB physical) with headroom; trivially fits v5e/v6e (128 MiB).
_VMEM_TILE_BUDGET_BYTES = 20 * 1024 * 1024
_VMEM_LIMIT_BYTES = 32 * 1024 * 1024
_MAX_TILE_V = 8192


# ----------------------------- kernels --------------------------------------

def cbow_kernel(ctx_ref, wT_ref, b_ref, out_ref):
    # ctx_ref: (tB, D)  compute dtype (bf16/f32)
    # wT_ref : (D, tV)  compute dtype — pre-transposed, V on lanes
    # b_ref  : (1, tV)  f32
    # out_ref: (tB, tV) f32
    logits = jnp.dot(ctx_ref[...], wT_ref[...],
                     preferred_element_type=jnp.float32)   # MXU, f32 accum
    out_ref[...] = logits + b_ref[...]                      # single VPU add


def cbow_kernel_int8(ctx_ref, wq_ref, scale_ref, b_ref, out_ref):
    # wq_ref   : (D, tV) int8 (HBM-resident form; DMA'd narrow)
    # scale_ref: (1, tV) f32 per-column dequant scale
    w = wq_ref[...].astype(ctx_ref.dtype)                   # cheap VPU cast
    logits = jnp.dot(ctx_ref[...], w,
                     preferred_element_type=jnp.float32)    # MXU, f32 accum
    out_ref[...] = logits * scale_ref[...] + b_ref[...]     # dequant + bias


# ----------------------- one-time weight preparation ------------------------

def prepare_cbow_params(lin_w, lin_b, *, compute_dtype=jnp.bfloat16,
                        weight_quant=None, tile_v=None):
    """Hoisted weight prep (call once at model init).

    lin_w: (V, D) f32 nn.Linear weight (PyTorch layout)
    lin_b: (V,)   f32
    weight_quant: None | "int8" (per-column scales; dequant in epilogue)
    Returns a dict of padded, kernel-ready tensors + tiling metadata.
    """
    V, D = lin_w.shape
    w_bytes = 1 if weight_quant == "int8" else jnp.dtype(compute_dtype).itemsize

    # ---- pick the vocab tile: big (multi-MiB) but within the VMEM budget ---
    if tile_v is None:
        tB_max = 128
        # Bytes per lane-column across double-buffered wT + out + bias/scale.
        per_col = 2 * D * w_bytes + 2 * tB_max * 4 + 16
        tV_cap = ((_VMEM_TILE_BUDGET_BYTES - 256 * 1024) // per_col) // 128 * 128
        tV = max(128, min(_MAX_TILE_V, tV_cap))
    else:
        tV = max(128, _round_up(tile_v, 128))

    Vp128 = _round_up(V, 128)
    if Vp128 <= tV:
        tV = Vp128
        Vp = Vp128
    else:
        Vp = _round_up(V, tV)

    # ---- transpose once to (D, V): MXU RHS with V on lanes -----------------
    wT = jnp.transpose(lin_w).astype(jnp.float32)            # (D, V)
    bias = lin_b.reshape(1, V).astype(jnp.float32)           # (1, V)

    if weight_quant == "int8":
        absmax = jnp.max(jnp.abs(wT), axis=0, keepdims=True)  # (1, V)
        scale = jnp.maximum(absmax, 1e-8) / 127.0
        w_store = jnp.clip(jnp.round(wT / scale), -127, 127).astype(jnp.int8)
        scale_store = scale
    else:
        w_store = wT.astype(compute_dtype)
        scale_store = None

    if Vp != V:
        pad = ((0, 0), (0, Vp - V))
        w_store = jnp.pad(w_store, pad)
        bias = jnp.pad(bias, pad)
        if scale_store is not None:
            scale_store = jnp.pad(scale_store, pad)

    return dict(wT=w_store, scale=scale_store, bias=bias,
                V=V, D=D, Vp=Vp, tV=tV,
                compute_dtype=compute_dtype, weight_quant=weight_quant)


# --------------------------------- forward ----------------------------------

def cbow_forward(context_idxs, emb_table, params, *, tile_b=None):
    """CBOW forward.

    context_idxs: (B, C) int32
    emb_table   : (V, D) f32  (nn.Embedding weight)
    params      : output of prepare_cbow_params (hoisted weight prep)
    returns     : (B, V) f32 logits
    """
    B, C = context_idxs.shape
    V, D, Vp, tV = params["V"], params["D"], params["Vp"], params["tV"]
    compute_dtype = params["compute_dtype"]

    # ---- XLA glue: embedding gather + context mean (fuses into the gather) --
    embeds = jnp.take(emb_table, context_idxs, axis=0)        # (B, C, D)
    ctx = (embeds.sum(axis=1) * (1.0 / C)).astype(compute_dtype)  # (B, D) mean

    # ---- batch tiling: sublane-aligned, <=128 to avoid ~2x padding ----------
    if tile_b is None:
        tB = min(_round_up(B, 8), 128)
    else:
        tB = min(_round_up(tile_b, 8), 128)
    Bp = _round_up(B, tB)
    if Bp != B:
        ctx = jnp.pad(ctx, ((0, Bp - B), (0, 0)))

    n_v = Vp // tV
    n_b = Bp // tB
    # Vocab OUTER, batch INNER: weight index_map depends only on the vocab
    # index, so each (D, tV) weight tile is DMA'd once and stays resident
    # across all batch tiles.
    grid = (n_v, n_b)

    if params["weight_quant"] == "int8":
        kernel = cbow_kernel_int8
        in_specs = [
            pl.BlockSpec((tB, D), lambda j, i: (i, 0)),   # ctx tile
            pl.BlockSpec((D, tV), lambda j, i: (0, j)),   # int8 weight tile
            pl.BlockSpec((1, tV), lambda j, i: (0, j)),   # per-column scale
            pl.BlockSpec((1, tV), lambda j, i: (0, j)),   # bias
        ]
        args = (ctx, params["wT"], params["scale"], params["bias"])
    else:
        kernel = cbow_kernel
        in_specs = [
            pl.BlockSpec((tB, D), lambda j, i: (i, 0)),   # ctx tile
            pl.BlockSpec((D, tV), lambda j, i: (0, j)),   # weight tile (resident)
            pl.BlockSpec((1, tV), lambda j, i: (0, j)),   # bias
        ]
        args = (ctx, params["wT"], params["bias"])

    out = pl.pallas_call(
        kernel,
        out_shape=jax.ShapeDtypeStruct((Bp, Vp), jnp.float32),
        grid_spec=pltpu.PrefetchScalarGridSpec(
            num_scalar_prefetch=0,
            grid=grid,
            in_specs=in_specs,
            out_specs=pl.BlockSpec((tB, tV), lambda j, i: (i, j)),
        ),
        compiler_params=pltpu.CompilerParams(
            dimension_semantics=("parallel", "parallel"),
            vmem_limit_bytes=_VMEM_LIMIT_BYTES),
    )(*args)

    return out[:B, :V]


# ------------------------------- reference ----------------------------------

def reference_forward(context_idxs, emb_table, lin_w, lin_b):
    embeds = jnp.take(emb_table, context_idxs, axis=0)
    ctx = embeds.mean(axis=1)
    return ctx @ lin_w.T + lin_b


# --------------------------------- tests ------------------------------------

def _make_inputs(key, vocab_size, embedding_dim, batch, context_len):
    k_emb, k_w, k_b, k_idx = jax.random.split(key, 4)
    emb_table = jax.random.normal(k_emb, (vocab_size, embedding_dim), jnp.float32)
    bound = 1.0 / jnp.sqrt(jnp.float32(embedding_dim))
    lin_w = jax.random.uniform(k_w, (vocab_size, embedding_dim), jnp.float32,
                               -bound, bound)
    lin_b = jax.random.uniform(k_b, (vocab_size,), jnp.float32, -bound, bound)
    context_idxs = jax.random.randint(k_idx, (batch, context_len), 0, vocab_size,
                                      dtype=jnp.int32)
    return context_idxs, emb_table, lin_w, lin_b


if __name__ == "__main__":
    key = jax.random.PRNGKey(0)
    k1, k2 = jax.random.split(key)

    # ---- Test 1: small shapes, single-tile grid ----------------------------
    ctx_idx, emb, w, b = _make_inputs(k1, vocab_size=256, embedding_dim=128,
                                      batch=8, context_len=4)
    ref = reference_forward(ctx_idx, emb, w, b)

    # f32 path: strict check.
    p_f32 = prepare_cbow_params(w, b, compute_dtype=jnp.float32)
    out_f32 = jax.block_until_ready(cbow_forward(ctx_idx, emb, p_f32))
    assert out_f32.shape == (8, 256)
    assert jnp.allclose(out_f32, ref, atol=1e-4, rtol=1e-4), "f32 mismatch"

    # bf16 operand path (f32 accumulation): looser tolerance.
    p_bf16 = prepare_cbow_params(w, b, compute_dtype=jnp.bfloat16)
    out_bf16 = jax.block_until_ready(cbow_forward(ctx_idx, emb, p_bf16))
    assert jnp.allclose(out_bf16, ref, atol=5e-2, rtol=5e-2), "bf16 mismatch"

    # ---- Test 2: multi-tile grid, V and B NOT multiples of tile sizes ------
    ctx_idx2, emb2, w2, b2 = _make_inputs(k2, vocab_size=1000, embedding_dim=64,
                                          batch=200, context_len=5)
    ref2 = reference_forward(ctx_idx2, emb2, w2, b2)

    # bf16, forced small tiles -> grid = (Vp/512, Bp/64) = (2, 4), padded B/V.
    p2_bf16 = prepare_cbow_params(w2, b2, compute_dtype=jnp.bfloat16, tile_v=512)
    out2_bf16 = jax.block_until_ready(cbow_forward(ctx_idx2, emb2, p2_bf16,
                                                   tile_b=64))
    assert out2_bf16.shape == (200, 1000)
    assert jnp.allclose(out2_bf16, ref2, atol=5e-2, rtol=5e-2), "multi-tile bf16 mismatch"

    # int8 weights (per-column scales), same multi-tile grid.
    p2_int8 = prepare_cbow_params(w2, b2, compute_dtype=jnp.bfloat16,
                                  weight_quant="int8", tile_v=512)
    out2_int8 = jax.block_until_ready(cbow_forward(ctx_idx2, emb2, p2_int8,
                                                   tile_b=64))
    assert jnp.allclose(out2_int8, ref2, atol=5e-2, rtol=5e-2), "int8 mismatch"

    print("KERNEL_OK")
</pallas_src>

<mosaic_0001>
module attributes {stable_mosaic.version = 11 : i64} {
  func.func @cbow_kernel(%arg0: i32, %arg1: i32, %arg2: memref<8x128xf32, #tpu.memory_space<vmem>>, %arg3: memref<128x256xf32, #tpu.memory_space<vmem>>, %arg4: memref<1x256xf32, #tpu.memory_space<vmem>>, %arg5: memref<8x256xf32, #tpu.memory_space<vmem>>) attributes {dimension_semantics = [#tpu.dimension_semantics<parallel>, #tpu.dimension_semantics<parallel>], iteration_bounds = array<i64: 1, 1>, scalar_prefetch = 0 : i64, scratch_operands = 0 : i64, tpu.core_type = #tpu.core_type<tc>, window_params = [{transform_indices = @transform_0, window_bounds = array<i64: 8, 128>}, {transform_indices = @transform_1, window_bounds = array<i64: 128, 256>}, {transform_indices = @transform_2, window_bounds = array<i64: 1, 256>}, {transform_indices = @transform_3, window_bounds = array<i64: 8, 256>}]} {
    %c0 = arith.constant 0 : index
    %c0_0 = arith.constant 0 : index
    %0 = vector.load %arg2[%c0, %c0_0] : memref<8x128xf32, #tpu.memory_space<vmem>>, vector<8x128xf32>
    %c0_1 = arith.constant 0 : index
    %c0_2 = arith.constant 0 : index
    %1 = vector.load %arg3[%c0_1, %c0_2] : memref<128x256xf32, #tpu.memory_space<vmem>>, vector<128x256xf32>
    %cst = arith.constant dense<0.000000e+00> : vector<8x256xf32>
    %2 = tpu.matmul %0, %1, %cst {dimension_numbers = #tpu.dot_dimension_numbers<[1], [0], [0], [1], [0, 0, 1, 1], [], []>} : vector<8x128xf32>, vector<128x256xf32>, vector<8x256xf32> -> vector<8x256xf32>
    %c0_3 = arith.constant 0 : index
    %c0_4 = arith.constant 0 : index
    %3 = vector.load %arg4[%c0_3, %c0_4] : memref<1x256xf32, #tpu.memory_space<vmem>>, vector<1x256xf32>
    %4 = vector.broadcast %3 : vector<1x256xf32> to vector<8x256xf32>
    %5 = arith.addf %2, %4 : vector<8x256xf32>
    %c0_5 = arith.constant 0 : index
    %c0_6 = arith.constant 0 : index
    %6 = vector.load %arg5[%c0_5, %c0_6] : memref<8x256xf32, #tpu.memory_space<vmem>>, vector<8x256xf32>
    tpu.vector_store %arg5[%c0_5, %c0_6], %5 {strides = array<i32>} : memref<8x256xf32, #tpu.memory_space<vmem>>, vector<8x256xf32>,
    return
  }
  func.func @transform_0(%arg0: i32, %arg1: i32) -> (i32, i32) {
    %c0_i32 = arith.constant 0 : i32
    %c0_i32_0 = arith.constant 0 : i32
    return %arg1, %c0_i32 : i32, i32
  }
  func.func @transform_1(%arg0: i32, %arg1: i32) -> (i32, i32) {
    %c0_i32 = arith.constant 0 : i32
    %c0_i32_0 = arith.constant 0 : i32
    return %c0_i32, %arg0 : i32, i32
  }
  func.func @transform_2(%arg0: i32, %arg1: i32) -> (i32, i32) {
    %c0_i32 = arith.constant 0 : i32
    %c0_i32_0 = arith.constant 0 : i32
    return %c0_i32, %arg0 : i32, i32
  }
  func.func @transform_3(%arg0: i32, %arg1: i32) -> (i32, i32) {
    %c0_i32 = arith.constant 0 : i32
    return %arg1, %arg0 : i32, i32
  }
}

</mosaic_0001>

<bundles_post_ra>
// kernel: tpu_custom_call.1
= control target key start
LH: loop header
LB: loop body
LE: loop exit
PB: predicated region body
PF: predicated region fallthrough
CT: control target
= control target key end

     0   :  { %8 = vsyncpa [#allocation3], 0  ;;  %s303_s0 = inlined_call_operand.hbm [shape: f32[8,128], index: 0, kind: input, shape index: {}]   ;;  %s304_s1 = inlined_call_operand.hbm [shape: f32[128,256], index: 1, kind: input, shape index: {}]   ;;  %s305_s2 = inlined_call_operand.hbm [shape: f32[1,256], index: 2, kind: input, shape index: {}]   ;;  %s306_s3 = inlined_call_operand.hbm [shape: f32[8,256], index: 3, kind: output, shape index: {}]  }
   0x1   :  { %9 = vsyncpa [#allocation6], 0  ;;  %s26_s14 = sshll.u32 %s304_s1, 4  ;;  %s27_s14 = int_to_ptr.hbm [resolvable:$true] %s26_s14 }
   0x2   :  { %10 = vsyncpa [#allocation4], 0  ;;  %s265_s15 = smov [#allocation5]   ;;  %s16_s19 = sshll.u32 %s303_s0, 4  ;;  %s17_s19 = int_to_ptr.hbm [resolvable:$true] %s16_s19 }
   0x3   :  { %s28_s16 = sshll.u32 %s265_s15, 4  ;;  %s266_s20 = smov 256   ;;  %s29_s16 = int_to_ptr.vmem [resolvable:$true] %s28_s16 }
   0x4   :  { %s267_s21 = smov 16   ;;  %s268_s22 = smov [#allocation2]  }
   0x5   :  { %34 = dma.hbm_to_vmem [thread:$0]  %s27_s14, 4096, %s29_s16, [#allocation6], %s266_s20, %s266_s20, %s267_s21  }
   0x6   :  { %s18_s23 = sshll.u32 %s268_s22, 4  ;;  %s40_s26 = sshll.u32 %s305_s2, 4  ;;  %s19_s23 = int_to_ptr.vmem [resolvable:$true] %s18_s23  ;;  %s41_s26 = int_to_ptr.hbm [resolvable:$true] %s40_s26 }
   0x7   :  { %21 = dma.hbm_to_vmem [thread:$0]  %s17_s19, 128, %s19_s23, [#allocation3]  }
   0x8   :  { %s269_s1 = smov [#allocation7]  }
   0x9   :  { %s42_s27 = sshll.u32 %s269_s1, 4  ;;  %s43_s27 = int_to_ptr.vmem [resolvable:$true] %s42_s27 }
   0xa   :  { %45 = dma.hbm_to_vmem [thread:$0]  %s41_s26, 32, %s43_s27, [#allocation6]  }
   0xb   :  { %259 = dma.done.wait [#allocation3], 128  }
   0xc   :  { %260 = vsyncadd [#allocation3], 4294967168 }
   0xd   :  { %261 = dma.done.wait [#allocation6], 4128  }
   0xe   :  { %262 = vsyncadd [#allocation6], 4294963168  ;;  %v89_v0 = vld [vmem:[#allocation5 + $0xf0] sm:$0xff]  ;;  %v90_v1 = vld [vmem:[#allocation5 + $0xf8] sm:$0xff]  ;;  %s270_s0 = smov [#allocation8]   ;;  %s146_s30 = sshll.u32 %s306_s3, 4  ;;  %s147_s30 = int_to_ptr.hbm [resolvable:$true] %s146_s30 }
   0xf   :  { %v87_v2 = vld [vmem:[#allocation5 + $0xe0] sm:$0xff]  ;;  %97 = vmatpush.msra.mxu0 %v89_v0  ;;  %117 = vmatpush.msra.mxu1 %v90_v1  ;;  %v88_v3 = vld [vmem:[#allocation5 + $0xe8] sm:$0xff]  ;;  %v85_v4 = vld [vmem:[#allocation5 + $0xd0] sm:$0xff]  ;;  %s144_s2 = sshll.u32 %s270_s0, 4  ;;  %s145_s2 = int_to_ptr.vmem [resolvable:$true] %s144_s2 }
  0x10   :  { %v86_v5 = vld [vmem:[#allocation5 + $0xd8] sm:$0xff]  ;;  %v83_v6 = vld [vmem:[#allocation5 + $0xc0] sm:$0xff]  ;;  %v84_v7 = vld [vmem:[#allocation5 + $0xc8] sm:$0xff] }
  0x11   :  { %98 = vmatpush.msra.mxu0 %v87_v2  ;;  %118 = vmatpush.msra.mxu1 %v88_v3  ;;  %v81_v8 = vld [vmem:[#allocation5 + $0xb0] sm:$0xff]  ;;  %v82_v9 = vld [vmem:[#allocation5 + $0xb8] sm:$0xff]  ;;  %v79_v10 = vld [vmem:[#allocation5 + $0xa0] sm:$0xff] }
  0x12   :  { %v80_v11 = vld [vmem:[#allocation5 + $0xa8] sm:$0xff]  ;;  %v77_v12 = vld [vmem:[#allocation5 + $0x90] sm:$0xff]  ;;  %v78_v13 = vld [vmem:[#allocation5 + $0x98] sm:$0xff] }
  0x13   :  { %99 = vmatpush.msra.mxu0 %v85_v4  ;;  %119 = vmatpush.msra.mxu1 %v86_v5  ;;  %v75_v14 = vld [vmem:[#allocation5 + $0x80] sm:$0xff]  ;;  %v76_v15 = vld [vmem:[#allocation5 + $0x88] sm:$0xff]  ;;  %v73_v16 = vld [vmem:[#allocation5 + $0x70] sm:$0xff] }
  0x14   :  { %v74_v17 = vld [vmem:[#allocation5 + $0x78] sm:$0xff]  ;;  %v71_v18 = vld [vmem:[#allocation5 + $0x60] sm:$0xff]  ;;  %v72_v19 = vld [vmem:[#allocation5 + $0x68] sm:$0xff] }
  0x15   :  { %100 = vmatpush.msra.mxu0 %v83_v6  ;;  %120 = vmatpush.msra.mxu1 %v84_v7  ;;  %v69_v20 = vld [vmem:[#allocation5 + $0x50] sm:$0xff]  ;;  %v70_v21 = vld [vmem:[#allocation5 + $0x58] sm:$0xff]  ;;  %v67_v22 = vld [vmem:[#allocation5 + $0x40] sm:$0xff] }
  0x16   :  { %v68_v23 = vld [vmem:[#allocation5 + $0x48] sm:$0xff]  ;;  %v65_v24 = vld [vmem:[#allocation5 + $0x30] sm:$0xff]  ;;  %v66_v25 = vld [vmem:[#allocation5 + $0x38] sm:$0xff] }
  0x17   :  { %101 = vmatpush.msra.mxu0 %v81_v8  ;;  %121 = vmatpush.msra.mxu1 %v82_v9  ;;  %v63_v26 = vld [vmem:[#allocation5 + $0x20] sm:$0xff]  ;;  %v64_v27 = vld [vmem:[#allocation5 + $0x28] sm:$0xff]  ;;  %v61_v28 = vld [vmem:[#allocation5 + $0x10] sm:$0xff] }
  0x18   :  { %v62_v29 = vld [vmem:[#allocation5 + $0x18] sm:$0xff]  ;;  %v59_v30 = vld [vmem:[#allocation5] sm:$0xff]  ;;  %v60_v31 = vld [vmem:[#allocation5 + $0x8] sm:$0xff] }
  0x19   :  { %102 = vmatpush.msra.mxu0 %v79_v10  ;;  %122 = vmatpush.msra.mxu1 %v80_v11  ;;  %v58_v32 = vld [vmem:[#allocation2] sm:$0xff]  ;;  %v91_v33 = vld [vmem:[#allocation7] sm:$0x3] }
  0x1a   :  { %v93_v34 = vperm.slane %v91_v33, 0  ;;  %v94_v35 = vperm.slane %v91_v33, 1 }
  0x1b   :  { %103 = vmatpush.msra.mxu0 %v77_v12  ;;  %123 = vmatpush.msra.mxu1 %v78_v13 }
  0x1d   :  { %104 = vmatpush.msra.mxu0 %v75_v14  ;;  %124 = vmatpush.msra.mxu1 %v76_v15 }
  0x1f   :  { %105 = vmatpush.msra.mxu0 %v73_v16  ;;  %125 = vmatpush.msra.mxu1 %v74_v17 }
  0x21   :  { %106 = vmatpush.msra.mxu0 %v71_v18  ;;  %126 = vmatpush.msra.mxu1 %v72_v19 }
  0x23   :  { %107 = vmatpush.msra.mxu0 %v69_v20  ;;  %127 = vmatpush.msra.mxu1 %v70_v21 }
  0x25   :  { %108 = vmatpush.msra.mxu0 %v67_v22  ;;  %128 = vmatpush.msra.mxu1 %v68_v23 }
  0x27   :  { %109 = vmatpush.msra.mxu0 %v65_v24  ;;  %129 = vmatpush.msra.mxu1 %v66_v25 }
  0x29   :  { %110 = vmatpush.msra.mxu0 %v63_v26  ;;  %130 = vmatpush.msra.mxu1 %v64_v27 }
  0x2b   :  { %111 = vmatpush.msra.mxu0 %v61_v28  ;;  %131 = vmatpush.msra.mxu1 %v62_v29 }
  0x2d   :  { %112 = vmatpush.msra.mxu0 %v59_v30  ;;  %132 = vmatpush.msra.mxu1 %v60_v31 }
  0x2e   :  { %113 = vmatmul.f32.vlgmr.msra.gmra.mxu0 %v58_v32  ;;  %133 = vmatmul.f32.vlgmr.msra.gmra.mxu1 %v58_v32 }
  0xab   :  { %v114_v36 = vpop.f32.mrf.mxu0  ;;  %v134_v37 = vpop.f32.mrf.mxu1 }
  0xac   :  { %v115_v38 = vadd.f32 %v114_v36, %v93_v34  ;;  %v135_v39 = vadd.f32 %v134_v37, %v94_v35 }
  0xae   :  { %137 = vst [vmem:[#allocation8] sm:$0xff] %v115_v38 }
  0xaf   :  { %138 = vst [vmem:[#allocation8 + $0x8] sm:$0xff] %v135_v39 }
  0xb0   :  { %149 = dma.vmem_to_hbm [thread:$0]  %s145_s2, 256, %s147_s30, [#allocation4]  }
  0xb1   :  { %263 = dma.done.wait [#allocation4], 256  }
  0xb2   :  { %264 = vsyncadd [#allocation4], 4294967040 }
  0xb3   :  { %154 = vsyncpa [#allocation3], 1 }
  0xb4   :  { %155 = vsyncpa [#allocation6], 1 }
  0xb5   :  { %156 = vsyncpa [#allocation4], 1 }

</bundles_post_ra>
